<compile_context>
chip_gen: v7x
topology: tpu7x:2x2x1
jax: 0.10.0
libtpu: 0.0.40
codegen_flags: <defaults>
</compile_context>

<pallas_src>
import functools
import math

import jax
import jax.numpy as jnp
from jax import lax
from jax.experimental import pallas as pl
from jax.experimental.pallas import tpu as pltpu


def _pool_out_size(size, kernel, stride, ceil_mode):
    """Output size matching torch.nn.MaxPool2d (padding=0, dilation=1)."""
    if ceil_mode:
        out = math.ceil((size - kernel) / stride) + 1
        # PyTorch rule: the last window must start inside the input.
        if (out - 1) * stride >= size:
            out -= 1
    else:
        out = (size - kernel) // stride + 1
    return out


def _round_up(x, m):
    return ((x + m - 1) // m) * m


def _chip_tuning():
    """Generation-aware row-block budget / VMEM limit / core count."""
    try:
        kind = jax.devices()[0].device_kind.lower()
    except Exception:  # pragma: no cover - defensive
        kind = ""
    single_tc = any(t in kind for t in ("v5e", "v5 lite", "v6e", "v6 lite", "v6"))
    if single_tc:
        # v5e / v6e: 128 MiB physical VMEM, one TensorCore -> big blocks,
        # no forced multi-step grid (extra steps are pure overhead).
        return dict(budget=48 * 1024 * 1024,
                    vmem_limit=100 * 1024 * 1024,
                    dual_tc=False)
    # v7x (and unknown chips): 64 MiB VMEM per TC, 2 TCs -> conservative
    # budget, keep >= 2 grid steps so ("parallel",) uses both cores.
    return dict(budget=20 * 1024 * 1024,
                vmem_limit=64 * 1024 * 1024,
                dual_tc=True)


def _maxpool_kernel(x_ref, o_ref, *, K, S, Wo, Wp, mm_dtype):
    # x_ref: (Rblk, K*Wp) — each row is one (plane, oh) output row; the lane
    #        axis packs (k_h, w) with w in [0, Wp).
    # o_ref: (Rblk, Wo)

    # ---- H pooling: elementwise max of the K lane chunks (pure VPU). ----
    ph = x_ref[:, 0:Wp]
    for k in range(1, K):
        ph = jnp.maximum(ph, x_ref[:, k * Wp:(k + 1) * Wp])
    # ph[r, w] = max over the K input rows of that H-window, at column w.

    # ---- W pooling, step 1: sliding max along lanes (pure VPU). ----
    Wr = (Wo - 1) * S + 1
    msl = ph[:, 0:Wr]
    for k in range(1, K):
        msl = jnp.maximum(msl, ph[:, k:k + Wr])
    # msl[r, w] = max(ph[r, w : w+K])

    # ---- W pooling, step 2: decimate lanes w -> S*w with ONE exact one-hot
    #      matmul on the otherwise-idle MXU (no per-window XLU reduces).
    #      Padding uses a *finite* dtype-min, so 0-weighted terms stay 0.
    #      (A literal +/-inf or NaN *input* value would propagate NaN here;
    #      finite activations — the nn.MaxPool2d use case — are exact.)
    w_ids = lax.broadcasted_iota(jnp.int32, (Wr, Wo), 0)
    q_ids = lax.broadcasted_iota(jnp.int32, (Wr, Wo), 1)
    sel = (w_ids == q_ids * S).astype(mm_dtype)
    out = jnp.dot(msl.astype(mm_dtype), sel,
                  preferred_element_type=jnp.float32)
    o_ref[...] = out.astype(o_ref.dtype)


def maxpool2d(x, kernel_size=3, stride=None, ceil_mode=True):
    """MaxPool2d over an NCHW tensor matching torch.nn.MaxPool2d semantics
    (padding=0, dilation=1, stride defaults to kernel_size)."""
    if stride is None:
        stride = kernel_size
    K, S = kernel_size, stride
    # TODO(synk): generalize to stride != kernel_size (overlapping windows);
    # nn.MaxPool2d(kernel_size=3, ceil_mode=True) uses stride == kernel_size.
    assert S == K, "this kernel assumes stride == kernel_size (PyTorch default)"

    N, C, H, W = x.shape
    Ho = _pool_out_size(H, K, S, ceil_mode)
    Wo = _pool_out_size(W, K, S, ceil_mode)
    Hp = (Ho - 1) * S + K          # == Ho * K  (since S == K)
    Wp = (Wo - 1) * S + K          # == Wo * K
    Wr = (Wo - 1) * S + 1
    P = N * C
    R = P * Ho                     # independent output rows
    Kw = K * Wp
    dtype = x.dtype
    ds = dtype.itemsize

    # Max-identity padding; kept FINITE so the one-hot decimation is exact
    # (0 * pad stays 0, no NaNs).  Integer dtypes route through f32 in the
    # decimation matmul: exact for |v| < 2**24.
    if jnp.issubdtype(dtype, jnp.floating):
        pad_val = float(jnp.finfo(dtype).min)
    else:
        pad_val = int(jnp.iinfo(dtype).min)

    # bf16 stays bf16 on the MXU (native rate, exact 0/1 selection with f32
    # accumulation); everything else is promoted to f32 for the selection.
    mm_dtype = jnp.bfloat16 if dtype == jnp.bfloat16 else jnp.float32

    planes = x.reshape(P, H, W)
    if Hp > H or Wp > W:
        planes = jnp.pad(planes, ((0, 0), (0, Hp - H), (0, Wp - W)),
                         constant_values=pad_val)
    # Free row-major reshape: input row oh*K + k of plane p becomes lane chunk
    # k of output row (p, oh) — H-pooling becomes elementwise lane-chunk maxima
    # and every output row is independent (2-D kernel, no in-kernel reshapes).
    rows = planes.reshape(R, Kw)

    # ---- rows per grid step: VMEM budget *including* kernel intermediates. --
    tune = _chip_tuning()
    lane = lambda n: _round_up(n, 128)
    mm_ds = jnp.dtype(mm_dtype).itemsize
    per_row = (
        2 * lane(Kw) * ds          # double-buffered input block
        + 2 * lane(Wo) * ds        # double-buffered output block
        + lane(Wp) * ds            # ph
        + lane(Wr) * ds            # msl
        + lane(Wr) * mm_ds         # msl in matmul dtype
        + lane(Wo) * 4             # f32 matmul result
    )
    if R <= 8:
        Rblk = R
    else:
        Rblk = max(8, tune["budget"] // per_row)
        if tune["dual_tc"] and R >= 16:
            Rblk = min(Rblk, pl.cdiv(R, 2))   # keep >= 2 steps for 2 TCs
        Rblk = min(Rblk, R)
        Rblk = max(8, (Rblk // 8) * 8)        # sublane-aligned block rows
    grid = (pl.cdiv(R, Rblk),)

    kernel = functools.partial(_maxpool_kernel, K=K, S=S, Wo=Wo, Wp=Wp,
                               mm_dtype=mm_dtype)

    cost = pl.CostEstimate(
        flops=R * (K * Wp + K * Wr) + 2 * R * Wr * Wo,
        transcendentals=0,
        bytes_accessed=(R * Kw + R * Wo) * ds,
    )

    out = pl.pallas_call(
        kernel,
        out_shape=jax.ShapeDtypeStruct((R, Wo), dtype),
        grid=grid,
        in_specs=[pl.BlockSpec((Rblk, Kw), lambda i: (i, 0))],
        out_specs=pl.BlockSpec((Rblk, Wo), lambda i: (i, 0)),
        compiler_params=pltpu.CompilerParams(
            dimension_semantics=("parallel",),
            vmem_limit_bytes=tune["vmem_limit"],
        ),
        cost_estimate=cost,
    )(rows)

    return out.reshape(N, C, Ho, Wo)


def _reference_maxpool(x, kernel_size=3, stride=None, ceil_mode=True):
    """Pure-JAX reference (small shapes only), matching PyTorch semantics."""
    if stride is None:
        stride = kernel_size
    N, C, H, W = x.shape
    Ho = _pool_out_size(H, kernel_size, stride, ceil_mode)
    Wo = _pool_out_size(W, kernel_size, stride, ceil_mode)
    out = jnp.zeros((N, C, Ho, Wo), x.dtype)
    for oh in range(Ho):
        h0, h1 = oh * stride, min(oh * stride + kernel_size, H)
        for ow in range(Wo):
            w0, w1 = ow * stride, min(ow * stride + kernel_size, W)
            out = out.at[:, :, oh, ow].set(
                jnp.max(x[:, :, h0:h1, w0:w1], axis=(2, 3))
            )
    return out


if __name__ == "__main__":
    key = jax.random.PRNGKey(0)
    # batch=2, channels=4, spatial=16x16 -> ceil_mode output is 6x6
    x = jax.random.normal(key, (2, 4, 16, 16), dtype=jnp.float32)

    out = maxpool2d(x, kernel_size=3, stride=3, ceil_mode=True)
    out = jax.block_until_ready(out)

    ref = _reference_maxpool(x, kernel_size=3, stride=3, ceil_mode=True)
    assert out.shape == (2, 4, 6, 6), out.shape
    assert jnp.allclose(out, ref), "mismatch vs reference"

    print("KERNEL_OK")
</pallas_src>

<mosaic_0001>
module attributes {stable_mosaic.version = 11 : i64} {
  func.func @_maxpool_kernel(%arg0: i32, %arg1: memref<24x54xf32, #tpu.memory_space<vmem>>, %arg2: memref<24x6xf32, #tpu.memory_space<vmem>>) attributes {dimension_semantics = [#tpu.dimension_semantics<parallel>], iteration_bounds = array<i64: 2>, scalar_prefetch = 0 : i64, scratch_operands = 0 : i64, tpu.core_type = #tpu.core_type<tc>, window_params = [{transform_indices = @transform_0, window_bounds = array<i64: 24, 54>}, {transform_indices = @transform_1, window_bounds = array<i64: 24, 6>}]} {
    %c0 = arith.constant 0 : index
    %c0_0 = arith.constant 0 : index
    %0 = vector.load %arg1[%c0, %c0_0] : memref<24x54xf32, #tpu.memory_space<vmem>>, vector<24x18xf32>
    %c0_1 = arith.constant 0 : index
    %c18 = arith.constant 18 : index
    %1 = vector.load %arg1[%c0_1, %c18] : memref<24x54xf32, #tpu.memory_space<vmem>>, vector<24x18xf32>
    %2 = arith.maximumf %0, %1 : vector<24x18xf32>
    %c0_2 = arith.constant 0 : index
    %c36 = arith.constant 36 : index
    %3 = vector.load %arg1[%c0_2, %c36] : memref<24x54xf32, #tpu.memory_space<vmem>>, vector<24x18xf32>
    %4 = arith.maximumf %2, %3 : vector<24x18xf32>
    %5 = vector.extract_strided_slice %4 {offsets = [0, 0], sizes = [24, 16], strides = [1, 1]} : vector<24x18xf32> to vector<24x16xf32>
    %6 = vector.extract_strided_slice %4 {offsets = [0, 1], sizes = [24, 16], strides = [1, 1]} : vector<24x18xf32> to vector<24x16xf32>
    %7 = arith.maximumf %5, %6 : vector<24x16xf32>
    %8 = vector.extract_strided_slice %4 {offsets = [0, 2], sizes = [24, 16], strides = [1, 1]} : vector<24x18xf32> to vector<24x16xf32>
    %9 = arith.maximumf %7, %8 : vector<24x16xf32>
    %10 = tpu.iota {dimensions = array<i32: 0>} : vector<16x6xi32>
    %11 = tpu.iota {dimensions = array<i32: 1>} : vector<16x6xi32>
    %c3_i32 = arith.constant 3 : i32
    %12 = vector.broadcast %c3_i32 : i32 to vector<16x6xi32>
    %13 = arith.muli %11, %12 : vector<16x6xi32>
    %14 = arith.cmpi eq, %10, %13 : vector<16x6xi32>
    %15 = arith.extui %14 : vector<16x6xi1> to vector<16x6xi32>
    %16 = arith.sitofp %15 : vector<16x6xi32> to vector<16x6xf32>
    %cst = arith.constant dense<0.000000e+00> : vector<24x6xf32>
    %17 = tpu.matmul %9, %16, %cst {dimension_numbers = #tpu.dot_dimension_numbers<[1], [0], [0], [1], [0, 0, 1, 1], [], []>} : vector<24x16xf32>, vector<16x6xf32>, vector<24x6xf32> -> vector<24x6xf32>
    %c0_3 = arith.constant 0 : index
    %c0_4 = arith.constant 0 : index
    %18 = vector.load %arg2[%c0_3, %c0_4] : memref<24x6xf32, #tpu.memory_space<vmem>>, vector<24x6xf32>
    tpu.vector_store %arg2[%c0_3, %c0_4], %17 {strides = array<i32>} : memref<24x6xf32, #tpu.memory_space<vmem>>, vector<24x6xf32>,
    return
  }
  func.func @transform_0(%arg0: i32) -> (i32, i32) {
    %c0_i32 = arith.constant 0 : i32
    %c0_i32_0 = arith.constant 0 : i32
    return %arg0, %c0_i32 : i32, i32
  }
  func.func @transform_1(%arg0: i32) -> (i32, i32) {
    %c0_i32 = arith.constant 0 : i32
    %c0_i32_0 = arith.constant 0 : i32
    return %arg0, %c0_i32 : i32, i32
  }
}

</mosaic_0001>

<bundles_post_ra>
// kernel: tpu_custom_call.1
= control target key start
LH: loop header
LB: loop body
LE: loop exit
PB: predicated region body
PF: predicated region fallthrough
CT: control target
= control target key end

     0   :  { %6 = vsyncpa [#allocation3], 0  ;;  %s772_s0 = inlined_call_operand.hbm [shape: f32[48,54], index: 0, kind: input, shape index: {}]   ;;  %s773_s1 = inlined_call_operand.hbm [shape: f32[48,6], index: 1, kind: output, shape index: {}]  }
   0x1   :  { %8 = vsyncpa [#allocation3 + $0x1], 0 }
   0x2   :  { %9 = vsyncpa [#allocation4], 0 }
   0x3   :  { %11 = vsyncpa [#allocation4 + $0x1], 0  ;;  %s609_s6 = smov 0   ;;  %s611_s7 = smov 0  }
   0x4   :  { %s613_s8 = smov 0   ;;  %s615_s9 = smov 0  }
   0x5 LB: > { %s630_s10 = sadd.s32 4294967295, %s583_s9   ;;  %s387_s11 = sadd.s32 4294967294, %s583_s9   ;;  %s583_s9 = sphi %s615_s9, %s785_s9   ;;  %s579_s8 = sphi %s613_s8, %s784_s8   ;;  %s575_s7 = sphi %s611_s7, %s783_s7   ;;  %s571_s6 = sphi %s609_s6, %s782_s6  }
   0x6   : > { %s634_s12 = sadd.s32 1, %s583_s9   ;;  %s24_s13 = sadd.s32 1, %s579_s8 }
   0x7   : > { %s21_s14 = ssub.s32 %s583_s9, %s634_s12  ;;  %p31_p0 = scmp.ne.s32.totalorder %s579_s8, %s575_s7 }
   0x8   : > { %p22_p1 = scmp.eq.s32.totalorder %s21_s14, 0  ;;  %p32_p2 = scmp.eq.s32.totalorder %s583_s9, 0 }
   0x9   : > { %p37_p3 = scmp.ne.s32.totalorder %s575_s7, %s571_s6  ;;  %p38_p4 = scmp.eq.s32.totalorder %s630_s10, 0 }
   0xa   : > { %s646_s15 = scalar_select %p22_p1, %s579_s8, %s24_s13  }
   0xb   : > { %p33_p5 = por %p32_p2, %p31_p0  ;;  %p648_p6 = por %p38_p4, %p37_p3 }
   0xc   : > { %p61_p7 = scmp.eq.s32.totalorder %s630_s10, 1  ;;  %p67_p8 = scmp.eq.s32.totalorder %s387_s11, 1 }
   0xd   : > { %p441_p10 = scmp.lt.s32.totalorder %s583_s9, 2  ;;  %s87_s19 = sand.u32 1, %s579_s8  }
   0xe   : > { %p655_p11 = por %p61_p7, %p31_p0  ;;  %p659_p12 = por %p67_p8, %p37_p3 }
   0xf   : > { %s402_s20 = smul.u32 384, %s583_s9  ;;  %p670_p13 = pnand %p441_p10, %p33_p5 }
  0x10   : > { %s776_s17 = scalar_select %p655_p11, 1, 0 }
  0x11   : > { %s777_s18 = scalar_select %p659_p12, 1, 0 }
  0x12   : > { %s427_s21 = smul.u32 24, %s87_s19  ;;  %s668_s24 = scalar_lea.hbm %s772_s0, %s402_s20 }
  0x13   : > { %s676_s28 = scalar_lea.sflag [#allocation3], %s87_s19  ;;  %s487_s29 = scalar_lea.hbm %s668_s24, 384 }
  0x14   : > { %s91_s26 = scalar_lea.vmem [#allocation2], %s427_s21  ;;  %p488_p0 = scmp.ne.s32.totalorder %s668_s24, %s487_s29 }
  0x15   : > { %s98_s27 = sshll.u32 %s91_s26, 4  ;;  %p489_p1 = pneg %p670_p13  ;;  %s674_s27 = int_to_ptr.vmem [resolvable:$true] %s98_s27 }
  0x16   : > { %s492_s3 = scalar_lea.hbm %s772_s0, 768  ;;  %p493_p4 = scmp.lt.u32.totalorder %s668_s24, %s772_s0 }
  0x17   : > { %p490_p2 = pnand %p489_p1, %p488_p0  ;;  %p494_p5 = scmp.lt.u32.totalorder %s492_s3, %s487_s29 }
  0x18   : > { %p496_p8 = scmp.lt.u32.totalorder %s487_s29, %s668_s24 }
  0x19   : > { %p491_p3 = pneg %p490_p2  ;;  %p495_p7 = por %p494_p5, %p493_p4 }
  0x1b   : > { %p497_p10 = por %p496_p8, %p495_p7 }
  0x1d   : > { %p498_p9 = pnand %p497_p10, %p491_p3 }
  0x1f   : > { %501 = shalt.err (!%p498_p9)
}
  0x20   : > { %s502_s11 = scalar_lea.vmem %s674_s27, 384  ;;  %s585_s13 = smov [#allocation2]  }
  0x21   : > { %p503_p0 = scmp.ne.s32.totalorder %s674_s27, %s502_s11  ;;  %s507_s14 = sshll.u32 %s585_s13, 4  ;;  %s508_s14 = int_to_ptr.vmem [resolvable:$false] %s507_s14 }
  0x22   : > { %s509_s19 = scalar_lea.vmem %s508_s14, 768  ;;  %p510_p11 = scmp.lt.s32.totalorder %s674_s27, %s508_s14 }
  0x23   : > { %p505_p2 = pnand %p503_p0, %p489_p1  ;;  %p511_p4 = scmp.lt.s32.totalorder %s509_s19, %s502_s11 }
  0x25   : > { %p506_p12 = pneg %p505_p2  ;;  %p512_p5 = por %p511_p4, %p510_p11 }
  0x27   : > { %p513_p7 = pnand %p512_p5, %p506_p12 }
  0x29   : > { %516 = shalt.err (!%p513_p7)
}
  0x2a   : > { %s586_s20 = smov 128   ;;  %s587_s21 = smov 8  }
  0x2b   : > { %436 = dma.hbm_to_vmem [thread:$0]  (!%p670_p13), %s668_s24, 384, %s674_s27, %s676_s28, %s586_s20, %s586_s20, %s587_s21  }
  0x2c   : > { %p391_p9 = scmp.ge.s32.totalorder %s583_s9, 1  ;;  %p106_p1 = scmp.lt.s32.totalorder %s583_s9, 3 }
  0x2e   : > { %p107_p3 = pnand %p391_p9, %p106_p1 }
  0x2f   : > { %s707_s22 = sand.u32 (!%p107_p3), 1, %s575_s7  }
  0x30   : > { %110 = sbr.rel (%p107_p3) target bundleno = 530 (0x212), region = 24  ;;  %s113_s26 = scalar_lea.sflag (!%p107_p3), [#allocation3], %s707_s22 }
  0x31   : > { %s428_s23 = smul.u32 (!%p107_p3), 24, %s707_s22 }
  0x33   : > { %s116_s29 = scalar_lea.vmem (!%p107_p3), [#allocation2], %s428_s23 }
  0x37   : > { %562 = dma.done.wait (%p648_p6), %s113_s26, 384  }
  0x38   : > { %564 = vsyncadd (%p648_p6), %s113_s26, 4294966912  ;;  %v138_v0 = vld [vmem:[%s116_s29 + $0x8] sm:$0xff]  ;;  %v137_v1 = vld [vmem:[%s116_s29] sm:$0xff]  ;;  %s588_s24 = smov 110   ;;  %s589_s25 = smov 92   ;;  %v194_v3 = vlaneseq  ;;  %v590_v8 = vmov 0.0|0.0  }
  0x39   : > { %145 = vrot.lane.b32.xlu0 %v138_v0, %s588_s24  ;;  %143 = vrot.lane.b32.xlu1 %v137_v1, %s588_s24  ;;  %v139_v2 = vld [vmem:[%s116_s29 + $0x10] sm:$0xff]  ;;  %v591_v9 = vmov 1.0|1.0   ;;  %vm592_vm3 = vmmov 0   ;;  %v593_v10 = vmov 0.0   ;;  %s594_s16 = smov 127  }
  0x3a   : > { %v195_v4 = vshrl.u32 %v194_v3, 7  ;;  %v198_v5 = vand.u32 127, %v194_v3  ;;  %425 = vmatprep.subr.bf16.mxu1 %v590_v8  ;;  %422 = vmatprep.subr.bf16.mxu0 %v590_v8  ;;  %s595_s27 = smov 126   ;;  %vm206_vm4 = vcmask 130048   ;;  %vm296_vm5 = vcmask 48128   ;;  %s134_s28 = scalar_lea.vmem [#allocation5], %s428_s23 }
  0x3b   : > { %416 = vmatprep.mubr.msk.f32.mxu1 %vm592_vm3, %v593_v10  ;;  %413 = vmatprep.mubr.msk.f32.mxu0 %vm592_vm3, %v593_v10  ;;  %s314_s30 = sshll.u32 %s134_s28, 4  ;;  %s403_s2 = smul.u32 384, %s630_s10  ;;  %s723_s30 = int_to_ptr.vmem [resolvable:$true] %s314_s30 }
  0x3c   : > { %v196_v6 = vadd.s32 8, %v195_v4  ;;  %v199_v7 = vmul.u32 3, %v198_v5  ;;  %s301_s11 = scalar_lea.sflag [#allocation4], %s707_s22  ;;  %s517_s10 = scalar_lea.vmem %s723_s30, 384 }
  0x3d   : > { %157 = vrot.lane.b32.xlu0 %v138_v0, %s589_s25  ;;  %147 = vrot.lane.b32.xlu1 %v139_v2, %s588_s24  ;;  %s728_s5 = scalar_lea.hbm %s773_s1, %s403_s2  ;;  %p518_p6 = scmp.ne.s32.totalorder %s723_s30, %s517_s10 }
  0x3e   : > { %vm200_vm0 = vcmp.eq.s32.totalorder %v195_v4, %v199_v7  ;;  %vm201_vm1 = vcmp.eq.s32.totalorder %v196_v6, %v199_v7  ;;  %p779_p11 = scmp.ne.s32.totalorder %s776_s17, 0  ;;  %s596_s13 = smov [#allocation5]  }
  0x3f   : > { %vm423_vm2 = vmpackc.low %vm201_vm1, %vm200_vm0  ;;  %s521_s14 = sshll.u32 %s596_s13, 4  ;;  %s522_s14 = int_to_ptr.vmem [resolvable:$false] %s521_s14 }
  0x40   : > { %426 = vmatpush3.bf16.msk.msra.mxu1 %vm423_vm2, %v591_v9  ;;  %424 = vmatpush3.bf16.msk.msra.mxu0 %vm423_vm2, %v591_v9  ;;  %p519_p12 = pnand %p518_p6, %p779_p11  ;;  %s523_s19 = scalar_lea.vmem %s522_s14, 768 }
  0x41   : > { %155 = vrot.lane.b32.xlu0 %v137_v1, %s589_s25  ;;  %159 = vrot.lane.b32.xlu1 %v139_v2, %s589_s25  ;;  %p524_p8 = scmp.lt.s32.totalorder %s723_s30, %s522_s14  ;;  %p525_p10 = scmp.lt.s32.totalorder %s523_s19, %s517_s10 }
  0x42   : > { %p520_p13 = pneg %p519_p12 }
  0x43   : > { %p526_p0 = por %p525_p10, %p524_p8 }
  0x45   : > { %p527_p2 = pnand %p526_p0, %p520_p13 }
  0xab   : > { %v146_v11 = vpop.permute.xlu0 %145  ;;  %v144_v12 = vpop.permute.xlu1 %143 }
  0xac   : > { %v153_v13 = vmax.f32 %v138_v0, %v146_v11  ;;  %v152_v17 = vmax.f32 %v137_v1, %v144_v12 }
  0xaf   : > { %v158_v14 = vpop.permute.xlu0 %157  ;;  %v148_v15 = vpop.permute.xlu1 %147 }
  0xb0   : > { %v165_v16 = vmax.f32 %v153_v13, %v158_v14  ;;  %v154_v18 = vmax.f32 %v139_v2, %v148_v15 }
  0xb2   : > { %172 = vrot.lane.b32.xlu0 %v165_v16, %s594_s16  ;;  %184 = vrot.lane.b32.xlu1 %v165_v16, %s595_s27 }
  0xb3   : > { %v156_v19 = vpop.permute.xlu0 %155  ;;  %v160_v20 = vpop.permute.xlu1 %159 }
  0xb4   : > { %v164_v21 = vmax.f32 %v152_v17, %v156_v19  ;;  %v166_v22 = vmax.f32 %v154_v18, %v160_v20 }
  0xb6   : > { %170 = vrot.lane.b32.xlu0 %v164_v21, %s594_s16  ;;  %174 = vrot.lane.b32.xlu1 %v166_v22, %s594_s16 }
  0xba   : > { %182 = vrot.lane.b32.xlu0 %v164_v21, %s595_s27  ;;  %186 = vrot.lane.b32.xlu1 %v166_v22, %s595_s27 }
 0x124   : > { %v173_v23 = vpop.permute.xlu0 %172  ;;  %v185_v24 = vpop.permute.xlu1 %184 }
 0x125   : > { %v180_v25 = vmax.f32 %v165_v16, %v173_v23 }
 0x127   : > { %v192_v26 = vmax.f32 %v180_v25, %v185_v24 }
 0x128   : > { %v171_v27 = vpop.permute.xlu0 %170  ;;  %v175_v28 = vpop.permute.xlu1 %174 }
 0x129   : > { %417 = vmatmul.mubr.msk.f32.vlgmr.msra.gmra.mrb[0].mxu1 %vm206_vm4, %v192_v26  ;;  %v179_v29 = vmax.f32 %v164_v21, %v171_v27  ;;  %v181_v30 = vmax.f32 %v166_v22, %v175_v28 }
 0x12a   : > { %419 = vmatprep.mubr.msk.f32.mxu1 %vm592_vm3, %v593_v10 }
 0x12c   : > { %v183_v31 = vpop.permute.xlu0 %182  ;;  %v187_v32 = vpop.permute.xlu1 %186 }
 0x12d   : > { %v191_v33 = vmax.f32 %v179_v29, %v183_v31  ;;  %v193_v34 = vmax.f32 %v181_v30, %v187_v32 }
 0x12f   : > { %414 = vmatmul.mubr.msk.f32.vlgmr.msra.gmra.mrb[0].mxu0 %vm206_vm4, %v191_v33  ;;  %420 = vmatmul.mubr.msk.f32.gmra.mrb[2].mxu1 %vm206_vm4, %v193_v34 }
 0x1fc   : > { %v287_v35 = vpop.f32.mrb[0].mxu1 }
 0x1fd   : > { %298 = vst.msk [vmem:[%s134_s28 + $0x8] sm:$0xff] %vm296_vm5, %v287_v35  ;;  %v418_v36 = vpop.f32.mrb[1].mxu1 }
 0x202   : > { %v282_v37 = vpop.f32.mrb[0].mxu0  ;;  %v292_v38 = vpop.f32.mrb[2].mxu1 }
 0x203   : > { %297 = vst.msk [vmem:[%s134_s28] sm:$0xff] %vm296_vm5, %v282_v37  ;;  %299 = vst.msk [vmem:[%s134_s28 + $0x10] sm:$0xff] %vm296_vm5, %v292_v38  ;;  %v415_v39 = vpop.f32.mrb[1].mxu0  ;;  %v421_v40 = vpop.f32.mrb[3].mxu1 }
 0x204   : > { %530 = shalt.err (!%p527_p2)
}
 0x205   : > { %s531_s20 = scalar_lea.hbm %s728_s5, 384  ;;  %s535_s26 = scalar_lea.hbm %s773_s1, 768 }
 0x206   : > { %p532_p4 = scmp.ne.s32.totalorder %s728_s5, %s531_s20  ;;  %p536_p9 = scmp.lt.u32.totalorder %s728_s5, %s773_s1 }
 0x207   : > { %p537_p1 = scmp.lt.u32.totalorder %s535_s26, %s531_s20  ;;  %p539_p6 = scmp.lt.u32.totalorder %s531_s20, %s728_s5 }
 0x208   : > { %p533_p5 = pnand %p532_p4, %p779_p11 }
 0x209   : > { %p538_p3 = por %p537_p1, %p536_p9 }
 0x20a   : > { %p534_p7 = pneg %p533_p5 }
 0x20b   : > { %p540_p12 = por %p539_p6, %p538_p3 }
 0x20d   : > { %p541_p13 = pnand %p540_p12, %p534_p7 }
 0x20f   : > { %544 = shalt.err (!%p541_p13)
}
 0x210   : > { %s597_s25 = smov 128   ;;  %s598_s16 = smov 8  }
 0x211   : > { %431 = dma.vmem_to_hbm [thread:$0]  (%p779_p11), %s723_s30, 384, %s728_s5, %s301_s11, %s597_s25, %s597_s25, %s598_s16  }
 0x212 PF: > { %s329_s27 = sand.u32 1, %s571_s6   ;;  %p780_p8 = scmp.ne.s32.totalorder %s777_s18, 0 }
 0x213   : > { %p781_p10 = scmp.ge.s32.totalorder %s583_s9, 2  ;;  %s330_s28 = scalar_lea.sflag [#allocation4], %s329_s27 }
 0x215   : > { %p438_p0 = pnand %p781_p10, %p780_p8 }
 0x217   : > { %566 = dma.done.wait (!%p438_p0), %s330_s28, 384  }
 0x218   : > { %568 = vsyncadd (!%p438_p0), %s330_s28, 4294966912  ;;  %p14_p2 = scmp.ge.s32.totalorder %s634_s12, 4   ;;  %s782_s6 = smov %s575_s7 }
 0x219   : > { %s783_s7 = smov %s579_s8  ;;  %s784_s8 = smov %s646_s15 }
 0x21a   : > { %s785_s9 = smov %s634_s12  ;;  %16 = sbr.rel (!%p14_p2) target bundleno = 5 (0x5), region = 69 }
 0x221   :  { %335 = vsyncpa [#allocation3], 1 }
 0x222   :  { %337 = vsyncpa [#allocation3 + $0x1], 1 }
 0x223   :  { %338 = vsyncpa [#allocation4], 1 }
 0x224   :  { %340 = vsyncpa [#allocation4 + $0x1], 1 }

</bundles_post_ra>
